<compile_context>
chip_gen: v5e
topology: v5e:2x2
jax: 0.10.0
libtpu: 0.0.40
codegen_flags: <defaults>
</compile_context>

<pallas_src>
import jax
import jax.numpy as jnp
from jax import lax
from jax.experimental import pallas as pl
from jax.experimental.pallas import tpu as pltpu


def _round_up(x, m):
    return (x + m - 1) // m * m


def _value_net_kernel(x_ref, w1_ref, b1_ref, w2_ref, b2_ref, w3_ref, b3_ref,
                      o_ref):
    """One batch tile.  Natural (TB, S) input layout; (H, TB) activations.

    x_ref : (TB, S) bf16     w1_ref: (H, S) bf16   b1_ref: (H, 1) f32
    w2_ref: (H, H)  bf16     b2_ref: (H, 1) f32
    w3_ref: (H, 1)  f32      b3_ref: (1, 1) f32  (SMEM scalar)
    o_ref : (1, TB) f32      (lane-dense output row)
    """
    x = x_ref[...]                                            # (TB, S) bf16

    # fc1: contract both operands' last (S) axis on the MXU -> (H, TB) f32.
    # The small x transpose Mosaic inserts lands on the otherwise-idle XLU
    # slot; batch stays on the lane axis for all downstream ops.
    h1 = lax.dot_general(w1_ref[...], x,
                         (((1,), (1,)), ((), ())),
                         preferred_element_type=jnp.float32)
    h1 = jnp.maximum(h1 + b1_ref[...], 0.0)                   # (H, TB) f32

    # fc2: bf16 operands on the MXU, f32 accumulation; bias+ReLU on the VPU.
    h2 = jnp.dot(w2_ref[...], h1.astype(jnp.bfloat16),
                 preferred_element_type=jnp.float32)
    h2 = jnp.maximum(h2 + b2_ref[...], 0.0)                   # (H, TB) f32

    # value head (out dim = 1): VPU multiply + cross-sublane (XLU) reduce.
    # Result is already lane-dense (1, TB).  (Only move this onto the MXU if
    # a bundle dump shows the VALU slot binding.)
    v = jnp.sum(h2 * w3_ref[...], axis=0, keepdims=True)      # (1, TB) f32
    o_ref[...] = (v + b3_ref[0, 0]).astype(o_ref.dtype)


def value_network_forward(states, params, *, tile_b=8192):
    """states: (B, state_dim) f32 -> (B,) f32, matching PyTorch semantics."""
    w1, b1 = params["w1"], params["b1"]      # (H, S), (H,)  torch (out, in)
    w2, b2 = params["w2"], params["b2"]      # (H, H), (H,)
    w3, b3 = params["w3"], params["b3"]      # (1, H), (1,)

    B, S = states.shape
    H = w1.shape[0]

    # Balanced lane-dense batch tiles (multiples of 128):
    #  * big tiles amortize the ~0.35 us/grid-step overhead,
    #  * >= 2 grid steps once the padded batch is >= 256 so v7x's two
    #    TensorCores both get work (no-op on single-TC v5e/v6e),
    #  * balanced sizing caps padding waste at < 128 rows per tile.
    n_tiles = pl.cdiv(B, tile_b)
    if _round_up(B, 128) >= 256:
        n_tiles = max(n_tiles, 2)
    TB = _round_up(pl.cdiv(B, n_tiles), 128)
    B_pad = n_tiles * TB

    # Natural (B_pad, S) layout: no wrapper-side transpose pass.  Only pad
    # (when needed) + bf16 cast happen before the kernel streams the x tiles.
    x = states
    if B_pad != B:
        x = jnp.pad(x, ((0, B_pad - B), (0, 0)))
    x = x.astype(jnp.bfloat16)

    w1k = w1.astype(jnp.bfloat16)                    # (H, S)
    w2k = w2.astype(jnp.bfloat16)                    # (H, H)
    b1k = b1.reshape(H, 1).astype(jnp.float32)
    b2k = b2.reshape(H, 1).astype(jnp.float32)
    w3k = w3.reshape(H, 1).astype(jnp.float32)
    b3k = b3.reshape(1, 1).astype(jnp.float32)

    const = lambda i: (0, 0)                         # VMEM-resident weights
    out = pl.pallas_call(
        _value_net_kernel,
        out_shape=jax.ShapeDtypeStruct((1, B_pad), jnp.float32),
        grid=(n_tiles,),
        in_specs=[
            # Streamed x tile.  (If the x DMA becomes exposed on v5e at very
            # large TB, add pipeline_mode=pl.Buffered(3) here.)
            pl.BlockSpec((TB, S), lambda i: (i, 0)),
            pl.BlockSpec((H, S), const),
            pl.BlockSpec((H, 1), const),
            pl.BlockSpec((H, H), const),
            pl.BlockSpec((H, 1), const),
            pl.BlockSpec((H, 1), const),
            pl.BlockSpec(memory_space=pltpu.MemorySpace.SMEM),   # b3 scalar
        ],
        out_specs=pl.BlockSpec((1, TB), lambda i: (0, i)),
        compiler_params=pltpu.CompilerParams(
            dimension_semantics=("parallel",)),
    )(x, w1k, b1k, w2k, b2k, w3k, b3k)

    # torch: self.value_head(x).squeeze(-1); drop padded lanes.
    return out[0, :B]


def init_params(key, state_dim, hidden_dim=64):
    """nn.Linear-style U(-1/sqrt(fan_in), 1/sqrt(fan_in)) init, torch (out,in) layout."""
    ks = jax.random.split(key, 6)

    def linear(kw, kb, fan_in, fan_out):
        bound = 1.0 / float(fan_in) ** 0.5
        w = jax.random.uniform(kw, (fan_out, fan_in), jnp.float32, -bound, bound)
        b = jax.random.uniform(kb, (fan_out,), jnp.float32, -bound, bound)
        return w, b

    w1, b1 = linear(ks[0], ks[1], state_dim, hidden_dim)
    w2, b2 = linear(ks[2], ks[3], hidden_dim, hidden_dim)
    w3, b3 = linear(ks[4], ks[5], hidden_dim, 1)
    return {"w1": w1, "b1": b1, "w2": w2, "b2": b2, "w3": w3, "b3": b3}


def _reference_forward(states, params):
    """Pure-JAX f32 reference (PyTorch semantics)."""
    h1 = jnp.maximum(states @ params["w1"].T + params["b1"], 0.0)
    h2 = jnp.maximum(h1 @ params["w2"].T + params["b2"], 0.0)
    return (h2 @ params["w3"].T + params["b3"])[:, 0]


if __name__ == "__main__":
    key = jax.random.PRNGKey(0)
    k_param, k_x = jax.random.split(key)

    batch, state_dim, hidden_dim = 8, 16, 64
    params = init_params(k_param, state_dim, hidden_dim)
    states = jax.random.normal(k_x, (batch, state_dim), dtype=jnp.float32)

    values = value_network_forward(states, params)
    jax.block_until_ready(values)

    ref = _reference_forward(states, params)
    assert values.shape == (batch,)
    # bf16 MXU operands vs the pure-f32 reference -> loosened tolerance.
    assert jnp.allclose(values, ref, atol=3e-2, rtol=3e-2), (
        float(jnp.max(jnp.abs(values - ref))))

    print("KERNEL_OK")
</pallas_src>

<mosaic_0001>
module attributes {stable_mosaic.version = 11 : i64} {
  func.func @_value_net_kernel(%arg0: i32, %arg1: memref<128x16xbf16, #tpu.memory_space<vmem>>, %arg2: memref<64x16xbf16, #tpu.memory_space<vmem>>, %arg3: memref<64x1xf32, #tpu.memory_space<vmem>>, %arg4: memref<64x64xbf16, #tpu.memory_space<vmem>>, %arg5: memref<64x1xf32, #tpu.memory_space<vmem>>, %arg6: memref<64x1xf32, #tpu.memory_space<vmem>>, %arg7: memref<1x1xf32, #tpu.memory_space<smem>>, %arg8: memref<1x128xf32, #tpu.memory_space<vmem>>) attributes {dimension_semantics = [#tpu.dimension_semantics<parallel>], iteration_bounds = array<i64: 1>, scalar_prefetch = 0 : i64, scratch_operands = 0 : i64, tpu.core_type = #tpu.core_type<tc>, window_params = [{transform_indices = @transform_0, window_bounds = array<i64: 128, 16>}, {pipeline_mode = #tpu.pipeline_mode<synchronous>, transform_indices = @transform_1, window_bounds = array<i64: 64, 16>}, {pipeline_mode = #tpu.pipeline_mode<synchronous>, transform_indices = @transform_2, window_bounds = array<i64: 64, 1>}, {pipeline_mode = #tpu.pipeline_mode<synchronous>, transform_indices = @transform_3, window_bounds = array<i64: 64, 64>}, {pipeline_mode = #tpu.pipeline_mode<synchronous>, transform_indices = @transform_4, window_bounds = array<i64: 64, 1>}, {pipeline_mode = #tpu.pipeline_mode<synchronous>, transform_indices = @transform_5, window_bounds = array<i64: 64, 1>}, {transform_indices = @transform_6, window_bounds = array<i64: 1, 1>}, {transform_indices = @transform_7, window_bounds = array<i64: 1, 128>}]} {
    %c0 = arith.constant 0 : index
    %c0_0 = arith.constant 0 : index
    %0 = vector.load %arg1[%c0, %c0_0] : memref<128x16xbf16, #tpu.memory_space<vmem>>, vector<128x16xbf16>
    %c0_1 = arith.constant 0 : index
    %c0_2 = arith.constant 0 : index
    %1 = vector.load %arg2[%c0_1, %c0_2] : memref<64x16xbf16, #tpu.memory_space<vmem>>, vector<64x16xbf16>
    %cst = arith.constant dense<0.000000e+00> : vector<64x128xf32>
    %2 = tpu.matmul %1, %0, %cst {dimension_numbers = #tpu.dot_dimension_numbers<[1], [1], [0], [0], [0, 0, 1, 0], [], []>} : vector<64x16xbf16>, vector<128x16xbf16>, vector<64x128xf32> -> vector<64x128xf32>
    %c0_3 = arith.constant 0 : index
    %c0_4 = arith.constant 0 : index
    %3 = vector.load %arg3[%c0_3, %c0_4] : memref<64x1xf32, #tpu.memory_space<vmem>>, vector<64x1xf32>
    %4 = vector.broadcast %3 : vector<64x1xf32> to vector<64x128xf32>
    %5 = arith.addf %2, %4 : vector<64x128xf32>
    %cst_5 = arith.constant 0.000000e+00 : f32
    %6 = vector.broadcast %cst_5 : f32 to vector<64x128xf32>
    %7 = arith.maximumf %5, %6 : vector<64x128xf32>
    %c0_6 = arith.constant 0 : index
    %c0_7 = arith.constant 0 : index
    %8 = vector.load %arg4[%c0_6, %c0_7] : memref<64x64xbf16, #tpu.memory_space<vmem>>, vector<64x64xbf16>
    %9 = arith.truncf %7 : vector<64x128xf32> to vector<64x128xbf16>
    %cst_8 = arith.constant dense<0.000000e+00> : vector<64x128xf32>
    %10 = tpu.matmul %8, %9, %cst_8 {dimension_numbers = #tpu.dot_dimension_numbers<[1], [0], [0], [1], [0, 0, 1, 1], [], []>} : vector<64x64xbf16>, vector<64x128xbf16>, vector<64x128xf32> -> vector<64x128xf32>
    %c0_9 = arith.constant 0 : index
    %c0_10 = arith.constant 0 : index
    %11 = vector.load %arg5[%c0_9, %c0_10] : memref<64x1xf32, #tpu.memory_space<vmem>>, vector<64x1xf32>
    %12 = vector.broadcast %11 : vector<64x1xf32> to vector<64x128xf32>
    %13 = arith.addf %10, %12 : vector<64x128xf32>
    %cst_11 = arith.constant 0.000000e+00 : f32
    %14 = vector.broadcast %cst_11 : f32 to vector<64x128xf32>
    %15 = arith.maximumf %13, %14 : vector<64x128xf32>
    %c0_12 = arith.constant 0 : index
    %c0_13 = arith.constant 0 : index
    %16 = vector.load %arg6[%c0_12, %c0_13] : memref<64x1xf32, #tpu.memory_space<vmem>>, vector<64x1xf32>
    %17 = vector.broadcast %16 : vector<64x1xf32> to vector<64x128xf32>
    %18 = arith.mulf %15, %17 : vector<64x128xf32>
    %cst_14 = arith.constant dense<0.000000e+00> : vector<128xf32>
    %19 = vector.multi_reduction <add>, %18, %cst_14 [0] : vector<64x128xf32> to vector<128xf32>
    %20 = vector.shape_cast %19 : vector<128xf32> to vector<1x128xf32>
    %c0_15 = arith.constant 0 : index
    %c0_16 = arith.constant 0 : index
    %21 = memref.load %arg7[%c0_15, %c0_16] : memref<1x1xf32, #tpu.memory_space<smem>>
    %22 = vector.broadcast %21 : f32 to vector<1x128xf32>
    %23 = arith.addf %20, %22 : vector<1x128xf32>
    %c0_17 = arith.constant 0 : index
    %c0_18 = arith.constant 0 : index
    %24 = vector.load %arg8[%c0_17, %c0_18] : memref<1x128xf32, #tpu.memory_space<vmem>>, vector<1x128xf32>
    tpu.vector_store %arg8[%c0_17, %c0_18], %23 {strides = array<i32>} : memref<1x128xf32, #tpu.memory_space<vmem>>, vector<1x128xf32>,
    return
  }
  func.func @transform_0(%arg0: i32) -> (i32, i32) {
    %c0_i32 = arith.constant 0 : i32
    %c0_i32_0 = arith.constant 0 : i32
    return %arg0, %c0_i32 : i32, i32
  }
  func.func @transform_1(%arg0: i32) -> (i32, i32) {
    %c0_i32 = arith.constant 0 : i32
    %c0_i32_0 = arith.constant 0 : i32
    %c0_i32_1 = arith.constant 0 : i32
    return %c0_i32, %c0_i32_0 : i32, i32
  }
  func.func @transform_2(%arg0: i32) -> (i32, i32) {
    %c0_i32 = arith.constant 0 : i32
    %c0_i32_0 = arith.constant 0 : i32
    %c0_i32_1 = arith.constant 0 : i32
    return %c0_i32, %c0_i32_0 : i32, i32
  }
  func.func @transform_3(%arg0: i32) -> (i32, i32) {
    %c0_i32 = arith.constant 0 : i32
    %c0_i32_0 = arith.constant 0 : i32
    %c0_i32_1 = arith.constant 0 : i32
    return %c0_i32, %c0_i32_0 : i32, i32
  }
  func.func @transform_4(%arg0: i32) -> (i32, i32) {
    %c0_i32 = arith.constant 0 : i32
    %c0_i32_0 = arith.constant 0 : i32
    %c0_i32_1 = arith.constant 0 : i32
    return %c0_i32, %c0_i32_0 : i32, i32
  }
  func.func @transform_5(%arg0: i32) -> (i32, i32) {
    %c0_i32 = arith.constant 0 : i32
    %c0_i32_0 = arith.constant 0 : i32
    %c0_i32_1 = arith.constant 0 : i32
    return %c0_i32, %c0_i32_0 : i32, i32
  }
  func.func @transform_6(%arg0: i32) -> (i32, i32) {
    %c0_i32 = arith.constant 0 : i32
    %c0_i32_0 = arith.constant 0 : i32
    %c0_i32_1 = arith.constant 0 : i32
    return %c0_i32, %c0_i32_0 : i32, i32
  }
  func.func @transform_7(%arg0: i32) -> (i32, i32) {
    %c0_i32 = arith.constant 0 : i32
    %c0_i32_0 = arith.constant 0 : i32
    return %c0_i32, %arg0 : i32, i32
  }
}

</mosaic_0001>

<bundles_post_ra>
// kernel: tpu_custom_call.1
= control target key start
LH: loop header
LB: loop body
LE: loop exit
PB: predicated region body
PF: predicated region fallthrough
CT: control target
= control target key end

     0   :  { %vm161_vm0 = vcmask 130048   ;;  %s769_s0 = inlined_call_operand.vmem [shape: bf16[128,16], index: 0, kind: input, shape index: {}]   ;;  %s770_s1 = inlined_call_operand.vmem [shape: bf16[64,16], index: 1, kind: input, shape index: {}]   ;;  %s771_s2 = inlined_call_operand.vmem [shape: f32[64,1], index: 2, kind: input, shape index: {}]   ;;  %s772_s3 = inlined_call_operand.vmem [shape: bf16[64,64], index: 3, kind: input, shape index: {}]   ;;  %s773_s4 = inlined_call_operand.vmem [shape: f32[64,1], index: 4, kind: input, shape index: {}]   ;;  %s774_s5 = inlined_call_operand.vmem [shape: f32[64,1], index: 5, kind: input, shape index: {}]   ;;  %s775_s6 = inlined_call_operand.<no memory space> [shape: f32[1,1], index: 6, kind: input, shape index: {}]   ;;  %s776_s7 = inlined_call_operand.hbm [shape: f32[1,128], index: 7, kind: output, shape index: {}]  }
   0x1   :  { %v533_v0 = vld [vmem:[%s769_s0 + $0x38] sm:$0xff] }
   0x2   :  { %13 = vsyncpa [#allocation4], 0  ;;  %v196_v1 = vsel %vm161_vm0, %v533_v0, 0  ;;  %v59_v2 = vld [vmem:[%s771_s2 + $0x30] sm:$0xff]  ;;  %v589_v4 = vmov 0   ;;  %v57_v6 = vld [vmem:[%s771_s2 + $0x20] sm:$0xff] }
   0x3   :  { %543 = vmatpush.bf16.xpose.msra.mxu3 %v196_v1  ;;  %198 = vmatpush.bf16.xpose.msra.mxu0 %v196_v1  ;;  %v532_v3 = vld [vmem:[%s769_s0 + $0x30] sm:$0xff]  ;;  %v60_v7 = vld [vmem:[%s771_s2 + $0x38] sm:$0xff]  ;;  %v531_v8 = vld [vmem:[%s769_s0 + $0x28] sm:$0xff]  ;;  %vm315_vm1 = vcmask 523264   ;;  %s590_s29 = smov [#allocation3]   ;;  %s445_s10 = sshll.u32 %s776_s7, 4  ;;  %s446_s10 = int_to_ptr.hbm [resolvable:$true] %s445_s10 }
   0x4   :  { %542 = vmatpush.bf16.xpose.msra.mxu2 %v196_v1  ;;  %560 = vset.pattern.permute.xlu0 %v589_v4  ;;  %v193_v5 = vsel %vm161_vm0, %v532_v3, 0  ;;  %v190_v9 = vsel %vm161_vm0, %v531_v8, 0  ;;  %v58_v10 = vld [vmem:[%s771_s2 + $0x28] sm:$0xff]  ;;  %v53_v11 = vld [vmem:[%s771_s2] sm:$0xff]  ;;  %v529_v15 = vld [vmem:[%s769_s0 + $0x18] sm:$0xff]  ;;  %s443_s30 = sshll.u32 %s590_s29, 4  ;;  %s444_s30 = int_to_ptr.vmem [resolvable:$true] %s443_s30 }
   0x5   :  { %93 = vperm.xlu0 %560, %v59_v2   ;;  %561 = vset.pattern.permute.xlu1 %v589_v4  ;;  %v530_v12 = vld [vmem:[%s769_s0 + $0x20] sm:$0xff]  ;;  %v54_v14 = vld [vmem:[%s771_s2 + $0x8] sm:$0xff]  ;;  %v184_v16 = vsel %vm161_vm0, %v529_v15, 0  ;;  %v249_v18 = vld [vmem:[%s773_s4 + $0x10] sm:$0xff] }
   0x6   :  { %562 = vset.pattern.permute.xlu2 %v589_v4  ;;  %83 = vperm.xlu1 %561, %v57_v6   ;;  %v187_v13 = vsel %vm161_vm0, %v530_v12, 0  ;;  %v248_v17 = vld [vmem:[%s773_s4 + $0x8] sm:$0xff]  ;;  %v55_v19 = vld [vmem:[%s771_s2 + $0x10] sm:$0xff]  ;;  %v251_v22 = vld [vmem:[%s773_s4 + $0x20] sm:$0xff] }
   0x7   :  { %v528_v20 = vld [vmem:[%s769_s0 + $0x10] sm:$0xff]  ;;  %73 = vperm.xlu2 %562, %v55_v19   ;;  %v365_v23 = vld [vmem:[%s774_s5] sm:$0xff]  ;;  %v527_v24 = vld [vmem:[%s769_s0 + $0x8] sm:$0xff] }
   0x8   :  { %v181_v21 = vsel %vm161_vm0, %v528_v20, 0  ;;  %v178_v25 = vsel %vm161_vm0, %v527_v24, 0  ;;  %v56_v26 = vld [vmem:[%s771_s2 + $0x18] sm:$0xff]  ;;  %v367_v27 = vld [vmem:[%s774_s5 + $0x10] sm:$0xff]  ;;  %v252_v28 = vld [vmem:[%s773_s4 + $0x28] sm:$0xff] }
   0x9   :  { %v526_v29 = vld [vmem:[%s769_s0] sm:$0xff]  ;;  %v253_v32 = vld [vmem:[%s773_s4 + $0x30] sm:$0xff]  ;;  %v535_v36 = vld [vmem:[%s770_s1 + $0x8] sm:$0xff] }
   0xa   :  { %v175_v30 = vsel %vm161_vm0, %v526_v29, 0  ;;  %v247_v31 = vld [vmem:[%s773_s4] sm:$0xff]  ;;  %v536_v34 = vld [vmem:[%s770_s1 + $0x10] sm:$0xff]  ;;  %v250_v37 = vld [vmem:[%s773_s4 + $0x18] sm:$0xff] }
   0xb   :  { %545 = vmatpush.bf16.xpose.msra.mxu3 %v193_v5  ;;  %199 = vmatpush.bf16.xpose.msra.mxu0 %v193_v5  ;;  %v369_v33 = vld [vmem:[%s774_s5 + $0x20] sm:$0xff]  ;;  %v370_v38 = vld [vmem:[%s774_s5 + $0x28] sm:$0xff]  ;;  %v371_v39 = vld [vmem:[%s774_s5 + $0x30] sm:$0xff] }
   0xc   :  { %544 = vmatpush.bf16.xpose.msra.mxu2 %v193_v5  ;;  %v534_v35 = vld [vmem:[%s770_s1] sm:$0xff]  ;;  %v366_v40 = vld [vmem:[%s774_s5 + $0x8] sm:$0xff]  ;;  %v537_v41 = vld [vmem:[%s770_s1 + $0x18] sm:$0xff] }
   0xd   :  { %98 = vperm.xlu0 %560, %v60_v7   ;;  %v368_v42 = vld [vmem:[%s774_s5 + $0x18] sm:$0xff]  ;;  %v540_v19 = vld [vmem:[%s772_s3 + $0x10] sm:$0xff] }
   0xe   :  { %88 = vperm.xlu1 %561, %v58_v10   ;;  %v254_v43 = vld [vmem:[%s773_s4 + $0x38] sm:$0xff] }
   0xf   :  { %78 = vperm.xlu2 %562, %v56_v26   ;;  %v372_v44 = vld [vmem:[%s774_s5 + $0x38] sm:$0xff] }
  0x10   :  { %v541_v20 = vld [vmem:[%s772_s3 + $0x18] sm:$0xff] }
  0x13   :  { %547 = vmatpush.bf16.xpose.msra.mxu3 %v190_v9  ;;  %200 = vmatpush.bf16.xpose.msra.mxu0 %v190_v9 }
  0x14   :  { %546 = vmatpush.bf16.xpose.msra.mxu2 %v190_v9 }
  0x15   :  { %63 = vperm.xlu0 %560, %v53_v11  }
  0x16   :  { %68 = vperm.xlu1 %561, %v54_v14  }
  0x17   :  { %257 = vperm.xlu2 %562, %v247_v31  }
  0x1b   :  { %549 = vmatpush.bf16.xpose.msra.mxu3 %v187_v13  ;;  %201 = vmatpush.bf16.xpose.msra.mxu0 %v187_v13 }
  0x1c   :  { %548 = vmatpush.bf16.xpose.msra.mxu2 %v187_v13 }
  0x1d   :  { %262 = vperm.xlu0 %560, %v248_v17   ;;  %v538_v17 = vld [vmem:[%s772_s3] sm:$0xff] }
  0x1e   :  { %267 = vperm.xlu1 %561, %v249_v18   ;;  %v539_v18 = vld [vmem:[%s772_s3 + $0x8] sm:$0xff] }
  0x1f   :  { %272 = vperm.xlu2 %562, %v250_v37  }
  0x23   :  { %551 = vmatpush.bf16.xpose.msra.mxu3 %v184_v16  ;;  %202 = vmatpush.bf16.xpose.msra.mxu0 %v184_v16 }
  0x24   :  { %550 = vmatpush.bf16.xpose.msra.mxu2 %v184_v16 }
  0x25   :  { %277 = vperm.xlu0 %560, %v251_v22  }
  0x26   :  { %375 = vperm.xlu1 %561, %v365_v23  }
  0x27   :  { %380 = vperm.xlu2 %562, %v366_v40  }
  0x2b   :  { %553 = vmatpush.bf16.xpose.msra.mxu3 %v181_v21  ;;  %203 = vmatpush.bf16.xpose.msra.mxu0 %v181_v21 }
  0x2c   :  { %552 = vmatpush.bf16.xpose.msra.mxu2 %v181_v21 }
  0x2d   :  { %385 = vperm.xlu0 %560, %v367_v27  }
  0x2e   :  { %282 = vperm.xlu1 %561, %v252_v28  }
  0x2f   :  { %390 = vperm.xlu2 %562, %v368_v42  }
  0x33   :  { %555 = vmatpush.bf16.xpose.msra.mxu3 %v178_v25  ;;  %204 = vmatpush.bf16.xpose.msra.mxu0 %v178_v25 }
  0x34   :  { %554 = vmatpush.bf16.xpose.msra.mxu2 %v178_v25 }
  0x35   :  { %287 = vperm.xlu0 %560, %v253_v32  }
  0x36   :  { %395 = vperm.xlu1 %561, %v369_v33  }
  0x37   :  { %292 = vperm.xlu2 %562, %v254_v43  }
  0x3b   :  { %557 = vmatpush.bf16.xpose.msra.mxu3 %v175_v30  ;;  %205 = vmatpush.bf16.xpose.msra.mxu0 %v175_v30 }
  0x3c   :  { %556 = vmatpush.bf16.xpose.msra.mxu2 %v175_v30 }
  0x3d   :  { %400 = vperm.xlu0 %560, %v370_v38  }
  0x3e   :  { %405 = vperm.xlu1 %561, %v371_v39  }
  0x3f   :  { %410 = vperm.xlu2 %562, %v372_v44  }
  0x42   :  { %504 = vmatmul.msk.bf16.vlgmr.msra.gmra.mxu3 %vm161_vm0, %v536_v34  ;;  %502 = vmatmul.msk.bf16.vlgmr.msra.gmra.mxu0 %vm161_vm0, %v534_v35 }
  0x43   :  { %503 = vmatmul.msk.bf16.vlgmr.msra.gmra.mxu2 %vm161_vm0, %v535_v36 }
  0x52   :  { %505 = vmatmul.msk.bf16.gmra.mxu3 %vm161_vm0, %v537_v41 }
  0x61   :  { %v74_v51 = vpop.permute.xlu2 %73 }
  0x69   :  { %v79_v63 = vpop.permute.xlu2 %78 }
  0x71   :  { %v258_v23 = vpop.permute.xlu2 %257 }
  0x77   :  { %v94_v47 = vpop.permute.xlu0 %93 }
  0x78   :  { %v84_v48 = vpop.permute.xlu1 %83 }
  0x79   :  { %v273_v27 = vpop.permute.xlu2 %272 }
  0x7f   :  { %v99_v53 = vpop.permute.xlu0 %98 }
  0x80   :  { %v89_v54 = vpop.permute.xlu1 %88 }
  0x81   :  { %v381_v31 = vpop.permute.xlu2 %380 }
  0x87   :  { %v64_v5 = vpop.permute.xlu0 %63 }
  0x88   :  { %v69_v7 = vpop.permute.xlu1 %68 }
  0x89   :  { %v391_v36 = vpop.permute.xlu2 %390 }
  0x8f   :  { %v263_v24 = vpop.permute.xlu0 %262 }
  0x90   :  { %v268_v25 = vpop.permute.xlu1 %267 }
  0x97   :  { %v278_v28 = vpop.permute.xlu0 %277 }
  0x98   :  { %v376_v30 = vpop.permute.xlu1 %375 }
  0x9f   :  { %v386_v33 = vpop.permute.xlu0 %385 }
  0xa0   :  { %v283_v34 = vpop.permute.xlu1 %282 }
  0xa7   :  { %v288_v42 = vpop.permute.xlu0 %287 }
  0xbf   :  { %v207_v52 = vpop.f32.mrf.mxu0 }
  0xc0   :  { %v208_v8 = vadd.f32 %v207_v52, %v64_v5 }
  0xc2   :  { %v227_v13 = vmax.f32 %v208_v8, 0.0 }
  0xc5   :  { %v217_v45 = vpop.f32.mrf.mxu3 }
  0xc6   :  { %v212_v49 = vpop.f32.mrf.mxu2  ;;  %v218_v60 = vadd.f32 %v217_v45, %v84_v48 }
  0xc7   :  { %v213_v1 = vadd.f32 %v212_v49, %v74_v51  ;;  %v209_v4 = vpop.f32.mrf.mxu0 }
  0xc8   :  { %v231_v6 = vmax.f32 %v218_v60, 0.0  ;;  %v210_v9 = vadd.f32 %v209_v4, %v69_v7 }
  0xc9   :  { %v229_v10 = vmax.f32 %v213_v1, 0.0 }
  0xca   :  { %v228_v14 = vmax.f32 %v210_v9, 0.0 }
  0xcc   :  { %v243_v16 = vpack.c.bf16 %v228_v14, %v227_v13 }
  0xcd   :  { %v219_v46 = vpop.f32.mrf.mxu3 }
  0xce   :  { %v220_v57 = vadd.f32 %v219_v46, %v89_v54  ;;  %v214_v59 = vpop.f32.mrf.mxu2  ;;  %v396_v46 = vpop.permute.xlu1 %395 }
  0xcf   :  { %v215_v2 = vadd.f32 %v214_v59, %v79_v63 }
  0xd0   :  { %v232_v0 = vmax.f32 %v220_v57, 0.0 }
  0xd1   :  { %v230_v11 = vmax.f32 %v215_v2, 0.0 }
  0xd2   :  { %v245_v12 = vpack.c.bf16 %v232_v0, %v231_v6 }
  0xd3   :  { %v244_v15 = vpack.c.bf16 %v230_v11, %v229_v10 }
  0xd5   :  { %v222_v50 = vpop.f32.mrf.mxu3 }
  0xd6   :  { %v223_v55 = vadd.f32 %v222_v50, %v94_v47  ;;  %v406_v1 = vpop.permute.xlu1 %405 }
  0xd8   :  { %v233_v61 = vmax.f32 %v223_v55, 0.0  ;;  %v293_v55 = vpop.permute.xlu2 %292 }
  0xdd   :  { %v224_v56 = vpop.f32.mrf.mxu3 }
  0xde   :  { %v225_v58 = vadd.f32 %v224_v56, %v99_v53 }
  0xe0   :  { %v234_v62 = vmax.f32 %v225_v58, 0.0  ;;  %v411_v8 = vpop.permute.xlu2 %410 }
  0xe2   :  { %v246_v3 = vpack.c.bf16 %v234_v62, %v233_v61  ;;  %v401_v62 = vpop.permute.xlu0 %400 }
  0xe4   :  { %332 = vmatpush.bf16.msra.mxu1 %v246_v3 }
  0xe8   :  { %333 = vmatpush.bf16.msra.mxu1 %v245_v12 }
  0xec   :  { %334 = vmatpush.bf16.msra.mxu1 %v244_v15 }
  0xf0   :  { %335 = vmatpush.bf16.msra.mxu1 %v243_v16 }
  0xf3   :  { %522 = vmatmul.msk.bf16.vlgmr.msra.gmra.mxu1 %vm315_vm1, %v538_v17  ;;  %v435_v17 = vstv %s775_s6 }
 0x103   :  { %523 = vmatmul.msk.bf16.gmra.mxu1 %vm315_vm1, %v539_v18 }
 0x113   :  { %524 = vmatmul.msk.bf16.gmra.mxu1 %vm315_vm1, %v540_v19 }
 0x123   :  { %525 = vmatmul.msk.bf16.gmra.mxu1 %vm315_vm1, %v541_v20 }
 0x170   :  { %v337_v21 = vpop.f32.mrf.mxu1 }
 0x171   :  { %v338_v38 = vadd.f32 %v337_v21, %v258_v23 }
 0x173   :  { %v357_v43 = vmax.f32 %v338_v38, 0.0 }
 0x175   :  { %v413_v51 = vmul.f32 %v376_v30, %v357_v43 }
 0x178   :  { %v339_v22 = vpop.f32.mrf.mxu1 }
 0x179   :  { %v340_v35 = vadd.f32 %v339_v22, %v263_v24 }
 0x17b   :  { %v358_v40 = vmax.f32 %v340_v35, 0.0 }
 0x17d   :  { %v414_v47 = vmul.f32 %v381_v31, %v358_v40 }
 0x17f   :  { %v421_v56 = vadd.f32 %v414_v47, %v413_v51 }
 0x180   :  { %v342_v26 = vpop.f32.mrf.mxu1 }
 0x181   :  { %v343_v39 = vadd.f32 %v342_v26, %v268_v25 }
 0x183   :  { %v359_v44 = vmax.f32 %v343_v39, 0.0 }
 0x185   :  { %v415_v52 = vmul.f32 %v386_v33, %v359_v44 }
 0x187   :  { %v422_v59 = vadd.f32 %v421_v56, %v415_v52 }
 0x188   :  { %v344_v29 = vpop.f32.mrf.mxu1 }
 0x189   :  { %v345_v41 = vadd.f32 %v344_v29, %v273_v27 }
 0x18b   :  { %v360_v48 = vmax.f32 %v345_v41, 0.0 }
 0x18d   :  { %v416_v57 = vmul.f32 %v391_v36, %v360_v48 }
 0x18f   :  { %v423_v63 = vadd.f32 %v422_v59, %v416_v57 }
 0x190   :  { %v347_v32 = vpop.f32.mrf.mxu1 }
 0x191   :  { %v348_v45 = vadd.f32 %v347_v32, %v278_v28 }
 0x193   :  { %v361_v53 = vmax.f32 %v348_v45, 0.0 }
 0x195   :  { %v417_v60 = vmul.f32 %v396_v46, %v361_v53 }
 0x197   :  { %v424_v3 = vadd.f32 %v423_v63, %v417_v60 }
 0x198   :  { %v349_v37 = vpop.f32.mrf.mxu1 }
 0x199   :  { %v350_v49 = vadd.f32 %v349_v37, %v283_v34 }
 0x19b   :  { %v362_v58 = vmax.f32 %v350_v49, 0.0 }
 0x19d   :  { %v418_v0 = vmul.f32 %v401_v62, %v362_v58 }
 0x19f   :  { %v425_v6 = vadd.f32 %v424_v3, %v418_v0 }
 0x1a0   :  { %v352_v50 = vpop.f32.mrf.mxu1 }
 0x1a1   :  { %v353_v54 = vadd.f32 %v352_v50, %v288_v42 }
 0x1a3   :  { %v363_v61 = vmax.f32 %v353_v54, 0.0 }
 0x1a5   :  { %v419_v4 = vmul.f32 %v406_v1, %v363_v61 }
 0x1a7   :  { %v426_v9 = vadd.f32 %v425_v6, %v419_v4 }
 0x1a8   :  { %v354_v2 = vpop.f32.mrf.mxu1 }
 0x1a9   :  { %v355_v5 = vadd.f32 %v354_v2, %v293_v55 }
 0x1ab   :  { %v364_v7 = vmax.f32 %v355_v5, 0.0 }
 0x1ad   :  { %v420_v10 = vmul.f32 %v411_v8, %v364_v7 }
 0x1af   :  { %v427_v11 = vadd.f32 %v426_v9, %v420_v10 }
 0x1b1   :  { %v428_v12 = vrot.slane %v427_v11, 4 }
 0x1b3   :  { %v429_v13 = vadd.f32 %v428_v12, %v427_v11 }
 0x1b5   :  { %v430_v14 = vrot.slane %v429_v13, 2 }
 0x1b7   :  { %v431_v15 = vadd.f32 %v430_v14, %v429_v13 }
 0x1b9   :  { %v432_v16 = vrot.slane %v431_v15, 1 }
 0x1bb   :  { %v433_v18 = vadd.f32 %v432_v16, %v431_v15 }
 0x1bd   :  { %v436_v19 = vadd.f32 %v435_v17, %v433_v18 }
 0x1bf   :  { %437 = vst [vmem:[#allocation3] sm:$0x1] %v436_v19 }
 0x1c0   :  { %448 = dma.vmem_to_hbm [thread:$0]  %s444_s30, 16, %s446_s10, [#allocation4]  }
 0x1c1   :  { %587 = dma.done.wait [#allocation4], 16  }
 0x1c2   :  { %588 = vsyncadd [#allocation4], 4294967280 }
 0x1c3   :  { %453 = vsyncpa [#allocation4], 1 }

</bundles_post_ra>
